<compile_context>
chip_gen: v7x
topology: tpu7x:2x2x1
jax: 0.10.0
libtpu: 0.0.40
codegen_flags: <defaults>
</compile_context>

<pallas_src>
import functools

import numpy as np
import jax
import jax.numpy as jnp
from jax.experimental import pallas as pl
from jax.experimental.pallas import tpu as pltpu


# ---------------- Pallas kernels ----------------

def _vote_matmul_kernel(x_ref, v_ref, o_ref, *, apply_relu, scale):
    # out = (relu?(x) @ V) * scale, accumulated over the K grid axis directly
    # in the resident f32 output block.  V holds exact 0/1 votes in bf16; the
    # f32 x tile is split bf16 hi/lo so both dots take the bf16 MXU path.
    k = pl.program_id(2)

    x = x_ref[...]
    if apply_relu:
        x = jnp.maximum(x, 0.0)
    x_hi = x.astype(jnp.bfloat16)
    x_lo = (x - x_hi.astype(jnp.float32)).astype(jnp.bfloat16)
    v = v_ref[...]
    part = (jnp.dot(x_hi, v, preferred_element_type=jnp.float32)
            + jnp.dot(x_lo, v, preferred_element_type=jnp.float32))

    @pl.when(k == 0)
    def _():
        o_ref[...] = part

    @pl.when(k > 0)
    def _():
        o_ref[...] = o_ref[...] + part

    if scale != 1.0:
        @pl.when(k == pl.num_programs(2) - 1)
        def _():
            o_ref[...] = o_ref[...] * scale      # once per output tile


def _conv_stack_kernel(y_ref, w1_ref, b1_ref, w2_ref, b2_ref, w3_ref, b3_ref,
                       w4_ref, b4_ref, o_ref, pad_ref, *, h, w):
    # Fused conv1..conv4 for one batch element, all intermediates in VMEM.
    #   y_ref  : (1, Cin, h*w)        activation, channels on sublanes
    #   w1_ref : (9, Cin, 1)          depthwise taps
    #   wX_ref : (9, Cout, Cin)       per-tap conv matrices
    #   bX_ref : (C, 1)
    #   pad_ref: (Cmax, h*w + 8*w)    zero-margined H-padded activation
    S = h * w
    m = 4 * w
    cmax = pad_ref.shape[0]

    # Only the two 4-row halo margins need zeros; they are never overwritten
    # by the data stores below.  Zero them every step (cheap: 8*w columns) so
    # the kernel stays correct if the B axis is split across TensorCores.
    zeros_margin = jnp.zeros((cmax, m), jnp.float32)
    pad_ref[:, 0:m] = zeros_margin
    pad_ref[:, m + S:m + S + m] = zeros_margin

    # ---- conv1: depthwise (9,1) + bias + ReLU (pure VPU MACs) ----
    a = y_ref[0]                                  # (Cin, S)
    cin = a.shape[0]
    pad_ref[0:cin, m:m + S] = a
    acc = jnp.zeros((cin, S), jnp.float32)
    # Static 9-tap loop: each shifted slice is consumed by its MAC (the
    # dependence chain through `acc` bounds live ranges); a fori_loop would
    # force dynamic lane-dim slicing, so the static unroll is kept.
    for k in range(9):
        acc = acc + pad_ref[0:cin, k * w:k * w + S] * w1_ref[k]
    a = jnp.maximum(acc + b1_ref[...], 0.0)

    # ---- conv2..4: (9,1) conv + bias + ReLU as nine small matmuls taken
    # straight out of pad_ref (no im2col staging buffer, no staging stores).
    # MXU has plenty of slack here (M = Cout, K = Cin are tiny). ----
    def conv_full(a, w_ref, b_ref):
        C = a.shape[0]
        cout = w_ref.shape[1]
        pad_ref[0:C, m:m + S] = a
        acc = jnp.zeros((cout, S), jnp.float32)
        for k in range(9):
            acc = acc + jnp.dot(w_ref[k], pad_ref[0:C, k * w:k * w + S],
                                preferred_element_type=jnp.float32)
        return jnp.maximum(acc + b_ref[...], 0.0)

    a = conv_full(a, w2_ref, b2_ref)
    a = conv_full(a, w3_ref, b3_ref)
    a = conv_full(a, w4_ref, b4_ref)
    o_ref[0] = a


# ---------------- pallas_call wrappers ----------------

def _pick_tile(dim, candidates):
    for t in candidates:
        if dim % t == 0:
            return t
    return dim      # fallback: full extent (guarded by the VMEM estimate)


def _vote_matmul(x, v, *, apply_relu, scale):
    M, K = x.shape
    _, N = v.shape
    tm = _pick_tile(M, (512, 256, 128))
    tn = _pick_tile(N, (512, 256, 128))
    tk = _pick_tile(K, (1024, 512, 256, 128))

    # Double-buffered x (f32) + V (bf16) blocks plus the resident f32 output
    # block.  Only raise the scoped-VMEM limit when the default would not
    # cover it; cap so odd fallback tiles cannot request more than physical.
    est = 2 * (tm * tk * 4 + tk * tn * 2) + tm * tn * 4
    vmem_limit = None
    if est > 24 * 1024 * 1024:
        vmem_limit = int(min(2 * est, 96 * 1024 * 1024))

    kernel = functools.partial(_vote_matmul_kernel,
                               apply_relu=apply_relu, scale=scale)
    return pl.pallas_call(
        kernel,
        out_shape=jax.ShapeDtypeStruct((M, N), jnp.float32),
        grid=(M // tm, N // tn, K // tk),
        in_specs=[pl.BlockSpec((tm, tk), lambda i, j, k: (i, k)),
                  pl.BlockSpec((tk, tn), lambda i, j, k: (k, j))],
        out_specs=pl.BlockSpec((tm, tn), lambda i, j, k: (i, j)),
        compiler_params=pltpu.CompilerParams(
            dimension_semantics=("parallel", "parallel", "arbitrary"),
            vmem_limit_bytes=vmem_limit),
    )(x, v)


def _conv_stack(y, params, h, w):
    B, cin, S = y.shape
    c2 = params["w2"].shape[1]
    c3 = params["w3"].shape[1]
    c4 = params["w4"].shape[1]
    cmax = max(cin, c2, c3, c4)
    kernel = functools.partial(_conv_stack_kernel, h=h, w=w)
    return pl.pallas_call(
        kernel,
        out_shape=jax.ShapeDtypeStruct((B, c4, S), jnp.float32),
        grid=(B,),
        in_specs=[
            pl.BlockSpec((1, cin, S), lambda b: (b, 0, 0)),
            pl.BlockSpec((9, cin, 1), lambda b: (0, 0, 0)),
            pl.BlockSpec((cin, 1), lambda b: (0, 0)),
            pl.BlockSpec((9, c2, cin), lambda b: (0, 0, 0)),
            pl.BlockSpec((c2, 1), lambda b: (0, 0)),
            pl.BlockSpec((9, c3, c2), lambda b: (0, 0, 0)),
            pl.BlockSpec((c3, 1), lambda b: (0, 0)),
            pl.BlockSpec((9, c4, c3), lambda b: (0, 0, 0)),
            pl.BlockSpec((c4, 1), lambda b: (0, 0)),
        ],
        out_specs=pl.BlockSpec((1, c4, S), lambda b: (b, 0, 0)),
        scratch_shapes=[pltpu.VMEM((cmax, S + 8 * w), jnp.float32)],
        compiler_params=pltpu.CompilerParams(dimension_semantics=("parallel",)),
    )(y, params["w1"], params["b1"], params["w2"], params["b2"],
      params["w3"], params["b3"], params["w4"], params["b4"])


# ---------------- HTIHT forward ----------------

def htiht_forward(x, params):
    B, Cin, r, c = x.shape
    h, w = params["hw"]
    S = h * w
    norm = float(max(r, c))

    # HT: relu(x) @ V / norm   (scale fused into the last K step)
    y = _vote_matmul(x.reshape(B * Cin, r * c), params["vote_ht"],
                     apply_relu=True, scale=1.0 / norm)           # (B*Cin, h*w)
    y = y.reshape(B, Cin, S)                                      # free reshape (NCHW-flat)

    # conv1..conv4, fused, VMEM-resident intermediates
    y = _conv_stack(y, params, h, w)                              # (B, Cout, h*w)
    Cout = y.shape[1]

    # IHT: y @ V^T  (y is already post-ReLU from conv4; V^T precomputed)
    out = _vote_matmul(y.reshape(B * Cout, S), params["vote_iht"],
                       apply_relu=False, scale=1.0)               # (B*Cout, r*c)
    return out.reshape(B, Cout, r, c)


# ---------------- deterministic parameter init ----------------

def init_params(key, vote_index, inplanes, outplanes):
    r, c, h, w = vote_index.shape
    V = vote_index.reshape(r * c, h * w)
    keys = jax.random.split(key, 8)

    # conv1: depthwise second-derivative-of-Gaussian filters.
    # TODO(synk): scipy.ndimage.gaussian_filter(order=2) replaced by the
    # closed-form 2nd derivative of a Gaussian on [-4, 4] with deterministic
    # sigmas; init-only difference.
    t = np.arange(-4, 5, dtype=np.float64)
    sigmas = np.linspace(1.0, 2.5, inplanes)
    z = []
    for s in sigmas:
        y = (t ** 2 - s ** 2) / (s ** 4) * np.exp(-t ** 2 / (2.0 * s ** 2))
        y = -y / np.sum(np.abs(y))
        z.append(y)
    w1 = jnp.asarray(np.stack(z).T, jnp.float32)[:, :, None]      # (9, inplanes, 1)

    def kaiming(k, cin, cout):
        # torch fan_out for weight (Cout, Cin, 9, 1) is Cout*9
        fan_out = cout * 9
        std = np.sqrt(2.0 / fan_out)
        return std * jax.random.normal(k, (9, cout, cin), jnp.float32)

    def bias(k, fan_in, cout):
        bound = 1.0 / np.sqrt(fan_in)
        return jax.random.uniform(k, (cout, 1), jnp.float32, -bound, bound)

    return dict(
        hw=(h, w),
        vote_ht=V.astype(jnp.bfloat16),       # 0/1 votes -> exact in bf16
        vote_iht=V.T.astype(jnp.bfloat16),    # V^T precomputed once
        w1=w1, b1=bias(keys[0], 9, inplanes),
        w2=kaiming(keys[1], inplanes, 2 * inplanes),
        b2=bias(keys[2], inplanes * 9, 2 * inplanes),
        w3=kaiming(keys[3], 2 * inplanes, outplanes),
        b3=bias(keys[4], 2 * inplanes * 9, outplanes),
        w4=kaiming(keys[5], outplanes, outplanes),
        b4=bias(keys[6], outplanes * 9, outplanes),
    )


# ---------------- pure-JAX reference (validation only) ----------------

def reference_forward(x, params):
    B, C, r, c = x.shape
    h, w = params["hw"]
    norm = float(max(r, c))
    V = params["vote_ht"].astype(jnp.float32)     # exact (0/1)
    hi = jax.lax.Precision.HIGHEST

    y = jnp.dot(jnp.maximum(x.reshape(B * C, r * c), 0.0), V, precision=hi) / norm
    y = y.reshape(B, C, h, w)                     # NCHW

    def dwconv(y, Wkc1, b):
        yp = jnp.pad(y, ((0, 0), (0, 0), (4, 4), (0, 0)))
        out = sum(yp[:, :, k:k + h, :] * Wkc1[k, :, 0][None, :, None, None]
                  for k in range(9))
        return jnp.maximum(out + b[:, 0][None, :, None, None], 0.0)

    def conv(y, Wk, b):                            # Wk: (9, Cout, Cin)
        yp = jnp.pad(y, ((0, 0), (0, 0), (4, 4), (0, 0)))
        out = sum(jnp.einsum('bihw,oi->bohw', yp[:, :, k:k + h, :], Wk[k],
                             precision=hi) for k in range(9))
        return jnp.maximum(out + b[:, 0][None, :, None, None], 0.0)

    y = dwconv(y, params["w1"], params["b1"])
    y = conv(y, params["w2"], params["b2"])
    y = conv(y, params["w3"], params["b3"])
    y = conv(y, params["w4"], params["b4"])
    Cout = y.shape[1]
    out = jnp.dot(jnp.maximum(y, 0.0).reshape(B * Cout, h * w), V.T, precision=hi)
    return out.reshape(B, Cout, r, c)


if __name__ == "__main__":
    key = jax.random.PRNGKey(0)
    k_vote, k_x, k_p = jax.random.split(key, 3)

    B, inplanes, outplanes = 2, 4, 4
    r = c = h = w = 16
    # synthetic 0/1 Hough voting tensor, shape (r, c, h, w)
    vote_index = jax.random.bernoulli(k_vote, 0.25, (r, c, h, w)).astype(jnp.float32)
    params = init_params(k_p, vote_index, inplanes, outplanes)

    x = jax.random.normal(k_x, (B, inplanes, r, c), jnp.float32)   # NCHW input

    out = jax.block_until_ready(htiht_forward(x, params))
    ref = jax.block_until_ready(reference_forward(x, params))

    assert out.shape == (B, outplanes, r, c), out.shape
    if not np.allclose(np.asarray(out), np.asarray(ref), rtol=1e-3, atol=1e-2):
        err = float(jnp.max(jnp.abs(out - ref)))
        raise SystemExit(f"mismatch vs reference, max abs err = {err}")
    print("KERNEL_OK")
</pallas_src>

<mosaic_0001>
module attributes {stable_mosaic.version = 11 : i64} {
  func.func @_vote_matmul_kernel(%arg0: i32, %arg1: i32, %arg2: i32, %arg3: memref<8x256xf32, #tpu.memory_space<vmem>>, %arg4: memref<256x256xbf16, #tpu.memory_space<vmem>>, %arg5: memref<8x256xf32, #tpu.memory_space<vmem>>) attributes {dimension_semantics = [#tpu.dimension_semantics<parallel>, #tpu.dimension_semantics<parallel>, #tpu.dimension_semantics<arbitrary>], iteration_bounds = array<i64: 1, 1, 1>, scalar_prefetch = 0 : i64, scratch_operands = 0 : i64, tpu.core_type = #tpu.core_type<tc>, window_params = [{transform_indices = @transform_0, window_bounds = array<i64: 8, 256>}, {transform_indices = @transform_1, window_bounds = array<i64: 256, 256>}, {transform_indices = @transform_2, window_bounds = array<i64: 8, 256>}]} {
    %c0 = arith.constant 0 : index
    %c0_0 = arith.constant 0 : index
    %0 = vector.load %arg3[%c0, %c0_0] : memref<8x256xf32, #tpu.memory_space<vmem>>, vector<8x256xf32>
    %cst = arith.constant 0.000000e+00 : f32
    %1 = vector.broadcast %cst : f32 to vector<8x256xf32>
    %2 = arith.maximumf %0, %1 : vector<8x256xf32>
    %3 = arith.truncf %2 : vector<8x256xf32> to vector<8x256xbf16>
    %4 = arith.extf %3 : vector<8x256xbf16> to vector<8x256xf32>
    %5 = arith.subf %2, %4 : vector<8x256xf32>
    %6 = arith.truncf %5 : vector<8x256xf32> to vector<8x256xbf16>
    %c0_1 = arith.constant 0 : index
    %c0_2 = arith.constant 0 : index
    %7 = vector.load %arg4[%c0_1, %c0_2] : memref<256x256xbf16, #tpu.memory_space<vmem>>, vector<256x256xbf16>
    %cst_3 = arith.constant dense<0.000000e+00> : vector<8x256xf32>
    %8 = tpu.matmul %3, %7, %cst_3 {dimension_numbers = #tpu.dot_dimension_numbers<[1], [0], [0], [1], [0, 0, 1, 1], [], []>} : vector<8x256xbf16>, vector<256x256xbf16>, vector<8x256xf32> -> vector<8x256xf32>
    %cst_4 = arith.constant dense<0.000000e+00> : vector<8x256xf32>
    %9 = tpu.matmul %6, %7, %cst_4 {dimension_numbers = #tpu.dot_dimension_numbers<[1], [0], [0], [1], [0, 0, 1, 1], [], []>} : vector<8x256xbf16>, vector<256x256xbf16>, vector<8x256xf32> -> vector<8x256xf32>
    %10 = arith.addf %8, %9 : vector<8x256xf32>
    %c0_i32 = arith.constant 0 : i32
    %11 = arith.cmpi eq, %arg2, %c0_i32 : i32
    %12 = arith.extui %11 : i1 to i32
    %c0_i32_5 = arith.constant 0 : i32
    %13 = arith.cmpi ne, %12, %c0_i32_5 : i32
    scf.if %13 {
      %c0_10 = arith.constant 0 : index
      %c0_11 = arith.constant 0 : index
      %20 = vector.load %arg5[%c0_10, %c0_11] : memref<8x256xf32, #tpu.memory_space<vmem>>, vector<8x256xf32>
      tpu.vector_store %arg5[%c0_10, %c0_11], %10 {strides = array<i32>} : memref<8x256xf32, #tpu.memory_space<vmem>>, vector<8x256xf32>,
    } else {
    }
    %c0_i32_6 = arith.constant 0 : i32
    %14 = arith.cmpi sgt, %arg2, %c0_i32_6 : i32
    %15 = arith.extui %14 : i1 to i32
    %c0_i32_7 = arith.constant 0 : i32
    %16 = arith.cmpi ne, %15, %c0_i32_7 : i32
    scf.if %16 {
      %c0_10 = arith.constant 0 : index
      %c0_11 = arith.constant 0 : index
      %20 = vector.load %arg5[%c0_10, %c0_11] : memref<8x256xf32, #tpu.memory_space<vmem>>, vector<8x256xf32>
      %21 = arith.addf %20, %10 : vector<8x256xf32>
      %c0_12 = arith.constant 0 : index
      %c0_13 = arith.constant 0 : index
      %22 = vector.load %arg5[%c0_12, %c0_13] : memref<8x256xf32, #tpu.memory_space<vmem>>, vector<8x256xf32>
      tpu.vector_store %arg5[%c0_12, %c0_13], %21 {strides = array<i32>} : memref<8x256xf32, #tpu.memory_space<vmem>>, vector<8x256xf32>,
    } else {
    }
    %c0_i32_8 = arith.constant 0 : i32
    %17 = arith.cmpi eq, %arg2, %c0_i32_8 : i32
    %18 = arith.extui %17 : i1 to i32
    %c0_i32_9 = arith.constant 0 : i32
    %19 = arith.cmpi ne, %18, %c0_i32_9 : i32
    scf.if %19 {
      %c0_10 = arith.constant 0 : index
      %c0_11 = arith.constant 0 : index
      %20 = vector.load %arg5[%c0_10, %c0_11] : memref<8x256xf32, #tpu.memory_space<vmem>>, vector<8x256xf32>
      %cst_12 = arith.constant 6.250000e-02 : f32
      %21 = vector.broadcast %cst_12 : f32 to vector<8x256xf32>
      %22 = arith.mulf %20, %21 : vector<8x256xf32>
      %c0_13 = arith.constant 0 : index
      %c0_14 = arith.constant 0 : index
      %23 = vector.load %arg5[%c0_13, %c0_14] : memref<8x256xf32, #tpu.memory_space<vmem>>, vector<8x256xf32>
      tpu.vector_store %arg5[%c0_13, %c0_14], %22 {strides = array<i32>} : memref<8x256xf32, #tpu.memory_space<vmem>>, vector<8x256xf32>,
    } else {
    }
    return
  }
  func.func @transform_0(%arg0: i32, %arg1: i32, %arg2: i32) -> (i32, i32) {
    %c0_i32 = arith.constant 0 : i32
    return %arg0, %arg2 : i32, i32
  }
  func.func @transform_1(%arg0: i32, %arg1: i32, %arg2: i32) -> (i32, i32) {
    %c0_i32 = arith.constant 0 : i32
    return %arg2, %arg1 : i32, i32
  }
  func.func @transform_2(%arg0: i32, %arg1: i32, %arg2: i32) -> (i32, i32) {
    %c0_i32 = arith.constant 0 : i32
    return %arg0, %arg1 : i32, i32
  }
}

</mosaic_0001>

<bundles_post_ra>
// kernel: tpu_custom_call.1
= control target key start
LH: loop header
LB: loop body
LE: loop exit
PB: predicated region body
PF: predicated region fallthrough
CT: control target
= control target key end

     0   :  { %7 = vsyncpa [#allocation3], 0  ;;  %s587_s0 = inlined_call_operand.hbm [shape: f32[8,256], index: 0, kind: input, shape index: {}]   ;;  %s588_s1 = inlined_call_operand.hbm [shape: bf16[256,256], index: 1, kind: input, shape index: {}]   ;;  %s589_s2 = inlined_call_operand.hbm [shape: f32[8,256], index: 2, kind: output, shape index: {}]  }
   0x1   :  { %8 = vsyncpa [#allocation6], 0 }
   0x2   :  { %9 = vsyncpa [#allocation4], 0  ;;  %s524_s9 = smov [#allocation2]   ;;  %s525_s11 = smov [#allocation5]  }
   0x3   :  { %s16_s10 = sshll.u32 %s524_s9, 4  ;;  %s25_s12 = sshll.u32 %s525_s11, 4  ;;  %s17_s10 = int_to_ptr.vmem [resolvable:$true] %s16_s10  ;;  %s544_s12 = int_to_ptr.vmem [resolvable:$true] %s25_s12 }
   0x4   :  { %s452_s15 = scalar_lea.hbm %s587_s0, 256 }
   0x5   :  { %p453_p0 = scmp.ne.s32.totalorder %s587_s0, %s452_s15  ;;  %p456_p1 = scmp.lt.u32.totalorder %s452_s15, %s587_s0 }
   0x7   :  { %p458_p2 = pnand %p456_p1, %p453_p0 }
   0x9   :  { %461 = shalt.err (!%p458_p2)
}
   0xa   :  { %s462_s20 = scalar_lea.vmem %s17_s10, 256  ;;  %p467_p4 = scmp.lt.s32.totalorder %s17_s10, %s17_s10 }
   0xb   :  { %p463_p3 = scmp.ne.s32.totalorder %s17_s10, %s462_s20  ;;  %p468_p5 = scmp.lt.s32.totalorder %s462_s20, %s462_s20 }
   0xd   :  { %p469_p6 = por %p468_p5, %p467_p4 }
   0xf   :  { %p470_p7 = pnand %p469_p6, %p463_p3 }
  0x11   :  { %473 = shalt.err (!%p470_p7)
}
  0x12   :  { %19 = dma.hbm_to_vmem [thread:$0]  %s587_s0, 256, %s17_s10, [#allocation3]  }
  0x13   :  { %s474_s25 = scalar_lea.hbm %s588_s1, 4096 }
  0x14   :  { %p475_p8 = scmp.ne.s32.totalorder %s588_s1, %s474_s25  ;;  %p478_p9 = scmp.lt.u32.totalorder %s474_s25, %s588_s1 }
  0x16   :  { %p480_p10 = pnand %p478_p9, %p475_p8 }
  0x18   :  { %483 = shalt.err (!%p480_p10)
}
  0x19   :  { %s484_s30 = scalar_lea.vmem %s544_s12, 4096  ;;  %p489_p12 = scmp.lt.s32.totalorder %s544_s12, %s544_s12 }
  0x1a   :  { %p485_p11 = scmp.ne.s32.totalorder %s544_s12, %s484_s30  ;;  %p490_p13 = scmp.lt.s32.totalorder %s484_s30, %s484_s30 }
  0x1c   :  { %p491_p0 = por %p490_p13, %p489_p12 }
  0x1e   :  { %p492_p1 = pnand %p491_p0, %p485_p11 }
  0x20   :  { %495 = shalt.err (!%p492_p1)
}
  0x21   :  { %s526_s0 = smov 128   ;;  %s527_s3 = smov 8  }
  0x22   :  { %31 = dma.hbm_to_vmem [thread:$0]  %s588_s1, 4096, %s544_s12, [#allocation6], %s526_s0, %s526_s0, %s527_s3  }
  0x23   :  { %518 = dma.done.wait [#allocation3], 256  }
  0x24   :  { %519 = vsyncadd [#allocation3], 4294967040 }
  0x25   :  { %520 = dma.done.wait [#allocation6], 4096  }
  0x26   :  { %521 = vsyncadd [#allocation6], 4294963200  ;;  %v404_v0 = vld [vmem:[#allocation5 + $0x4] ss:$8 sps:$4 sm:$0xff]   ;;  %v406_v1 = vld [vmem:[#allocation5] ss:$8 sps:$4 sm:$0xff]  }
  0x27   :  { %242 = vmatprep.subr.bf16.mxu1 %v404_v0  ;;  %283 = vmatprep.subr.bf16.mxu0 %v404_v0  ;;  %v407_v2 = vld [vmem:[#allocation5 + $0x14] ss:$8 sps:$4 sm:$0xff]   ;;  %v409_v3 = vld [vmem:[#allocation5 + $0x10] ss:$8 sps:$4 sm:$0xff]   ;;  %v410_v4 = vld [vmem:[#allocation5 + $0x24] ss:$8 sps:$4 sm:$0xff]  }
  0x28   :  { %243 = vmatpush1.bf16.msra.mxu1 %v406_v1  ;;  %284 = vmatpush1.bf16.msra.mxu0 %v406_v1  ;;  %v412_v5 = vld [vmem:[#allocation5 + $0x20] ss:$8 sps:$4 sm:$0xff]   ;;  %v413_v6 = vld [vmem:[#allocation5 + $0x34] ss:$8 sps:$4 sm:$0xff]   ;;  %v415_v7 = vld [vmem:[#allocation5 + $0x30] ss:$8 sps:$4 sm:$0xff]  }
  0x29   :  { %244 = vmatprep.subr.bf16.mxu1 %v407_v2  ;;  %285 = vmatprep.subr.bf16.mxu0 %v407_v2  ;;  %v416_v8 = vld [vmem:[#allocation5 + $0x44] ss:$8 sps:$4 sm:$0xff]   ;;  %v418_v9 = vld [vmem:[#allocation5 + $0x40] ss:$8 sps:$4 sm:$0xff]   ;;  %v419_v10 = vld [vmem:[#allocation5 + $0x54] ss:$8 sps:$4 sm:$0xff]  }
  0x2a   :  { %v421_v11 = vld [vmem:[#allocation5 + $0x50] ss:$8 sps:$4 sm:$0xff]   ;;  %v422_v12 = vld [vmem:[#allocation5 + $0x64] ss:$8 sps:$4 sm:$0xff]   ;;  %v424_v15 = vld [vmem:[#allocation5 + $0x60] ss:$8 sps:$4 sm:$0xff]  }
  0x2b   :  { %v39_v13 = vld [vmem:[#allocation2 + $0x8] sm:$0xff]  ;;  %v428_v20 = vld [vmem:[#allocation5 + $0x84] ss:$8 sps:$4 sm:$0xff]   ;;  %v430_v23 = vld [vmem:[#allocation5 + $0x80] ss:$8 sps:$4 sm:$0xff]   ;;  %s528_s1 = smov [#allocation7]  }
  0x2c   :  { %245 = vmatpush1.bf16.msra.mxu1 %v409_v3  ;;  %286 = vmatpush1.bf16.msra.mxu0 %v409_v3  ;;  %v41_v14 = vmax.f32 %v39_v13, 0.0  ;;  %v425_v16 = vld [vmem:[#allocation5 + $0x74] ss:$8 sps:$4 sm:$0xff]   ;;  %v427_v19 = vld [vmem:[#allocation5 + $0x70] ss:$8 sps:$4 sm:$0xff]   ;;  %s355_s6 = sshll.u32 %s528_s1, 4  ;;  %s356_s6 = int_to_ptr.vmem [resolvable:$true] %s355_s6 }
  0x2d   :  { %246 = vmatprep.subr.bf16.mxu1 %v410_v4  ;;  %287 = vmatprep.subr.bf16.mxu0 %v410_v4  ;;  %v431_v24 = vld [vmem:[#allocation5 + $0x94] ss:$8 sps:$4 sm:$0xff]   ;;  %v433_v25 = vld [vmem:[#allocation5 + $0x90] ss:$8 sps:$4 sm:$0xff]   ;;  %v434_v26 = vld [vmem:[#allocation5 + $0xa4] ss:$8 sps:$4 sm:$0xff]   ;;  %p501_p3 = scmp.lt.s32.totalorder %s356_s6, %s356_s6 }
  0x2e   :  { %v43_v17 = vpack.c.bf16 %v41_v14, %v41_v14  ;;  %v436_v27 = vld [vmem:[#allocation5 + $0xa0] ss:$8 sps:$4 sm:$0xff]   ;;  %v437_v28 = vld [vmem:[#allocation5 + $0xb4] ss:$8 sps:$4 sm:$0xff]   ;;  %v439_v29 = vld [vmem:[#allocation5 + $0xb0] ss:$8 sps:$4 sm:$0xff]  }
  0x2f   :  { %v38_v30 = vld [vmem:[#allocation2] sm:$0xff]  ;;  %v440_v31 = vld [vmem:[#allocation5 + $0xc4] ss:$8 sps:$4 sm:$0xff]   ;;  %v442_v33 = vld [vmem:[#allocation5 + $0xc0] ss:$8 sps:$4 sm:$0xff]   ;;  %s496_s7 = scalar_lea.vmem %s356_s6, 256 }
  0x30   :  { %247 = vmatpush1.bf16.msra.mxu1 %v412_v5  ;;  %288 = vmatpush1.bf16.msra.mxu0 %v412_v5  ;;  %v45_v18 = vunpack.c.l.bf16 %v43_v17  ;;  %v40_v32 = vmax.f32 %v38_v30, 0.0  ;;  %v443_v34 = vld [vmem:[#allocation5 + $0xd4] ss:$8 sps:$4 sm:$0xff]   ;;  %v445_v36 = vld [vmem:[#allocation5 + $0xd0] ss:$8 sps:$4 sm:$0xff]   ;;  %p497_p2 = scmp.ne.s32.totalorder %s356_s6, %s496_s7  ;;  %p502_p4 = scmp.lt.s32.totalorder %s496_s7, %s496_s7 }
  0x31   :  { %248 = vmatprep.subr.bf16.mxu1 %v413_v6  ;;  %289 = vmatprep.subr.bf16.mxu0 %v413_v6  ;;  %v446_v37 = vld [vmem:[#allocation5 + $0xe4] ss:$8 sps:$4 sm:$0xff]   ;;  %v448_v39 = vld [vmem:[#allocation5 + $0xe0] ss:$8 sps:$4 sm:$0xff]   ;;  %v449_v40 = vld [vmem:[#allocation5 + $0xf4] ss:$8 sps:$4 sm:$0xff]  }
  0x32   :  { %315 = vmatprep.mubr.bf16.mxu0 %v43_v17  ;;  %v47_v21 = vsub.f32 %v41_v14, %v45_v18  ;;  %v42_v35 = vpack.c.bf16 %v40_v32, %v40_v32  ;;  %v451_v42 = vld [vmem:[#allocation5 + $0xf0] ss:$8 sps:$4 sm:$0xff]   ;;  %p503_p5 = por %p502_p4, %p501_p3 }
  0x34   :  { %249 = vmatpush1.bf16.msra.mxu1 %v415_v7  ;;  %290 = vmatpush1.bf16.msra.mxu0 %v415_v7  ;;  %v49_v22 = vpack.c.bf16 %v47_v21, %v47_v21  ;;  %v44_v38 = vunpack.c.l.bf16 %v42_v35  ;;  %p504_p6 = pnand %p503_p5, %p497_p2 }
  0x35   :  { %250 = vmatprep.subr.bf16.mxu1 %v416_v8  ;;  %291 = vmatprep.subr.bf16.mxu0 %v416_v8 }
  0x36   :  { %274 = vmatprep.mubr.bf16.mxu1 %v49_v22  ;;  %v46_v41 = vsub.f32 %v40_v32, %v44_v38 }
  0x38   :  { %251 = vmatpush1.bf16.msra.mxu1 %v418_v9  ;;  %292 = vmatpush1.bf16.msra.mxu0 %v418_v9  ;;  %v48_v43 = vpack.c.bf16 %v46_v41, %v46_v41 }
  0x39   :  { %252 = vmatprep.subr.bf16.mxu1 %v419_v10  ;;  %293 = vmatprep.subr.bf16.mxu0 %v419_v10 }
  0x3c   :  { %253 = vmatpush1.bf16.msra.mxu1 %v421_v11  ;;  %294 = vmatpush1.bf16.msra.mxu0 %v421_v11 }
  0x3d   :  { %254 = vmatprep.subr.bf16.mxu1 %v422_v12  ;;  %295 = vmatprep.subr.bf16.mxu0 %v422_v12 }
  0x40   :  { %255 = vmatpush1.bf16.msra.mxu1 %v424_v15  ;;  %296 = vmatpush1.bf16.msra.mxu0 %v424_v15 }
  0x41   :  { %256 = vmatprep.subr.bf16.mxu1 %v425_v16  ;;  %297 = vmatprep.subr.bf16.mxu0 %v425_v16 }
  0x44   :  { %257 = vmatpush1.bf16.msra.mxu1 %v427_v19  ;;  %298 = vmatpush1.bf16.msra.mxu0 %v427_v19 }
  0x45   :  { %258 = vmatprep.subr.bf16.mxu1 %v428_v20  ;;  %299 = vmatprep.subr.bf16.mxu0 %v428_v20 }
  0x48   :  { %259 = vmatpush1.bf16.msra.mxu1 %v430_v23  ;;  %300 = vmatpush1.bf16.msra.mxu0 %v430_v23 }
  0x49   :  { %260 = vmatprep.subr.bf16.mxu1 %v431_v24  ;;  %301 = vmatprep.subr.bf16.mxu0 %v431_v24 }
  0x4c   :  { %261 = vmatpush1.bf16.msra.mxu1 %v433_v25  ;;  %302 = vmatpush1.bf16.msra.mxu0 %v433_v25 }
  0x4d   :  { %262 = vmatprep.subr.bf16.mxu1 %v434_v26  ;;  %303 = vmatprep.subr.bf16.mxu0 %v434_v26 }
  0x50   :  { %263 = vmatpush1.bf16.msra.mxu1 %v436_v27  ;;  %304 = vmatpush1.bf16.msra.mxu0 %v436_v27 }
  0x51   :  { %264 = vmatprep.subr.bf16.mxu1 %v437_v28  ;;  %305 = vmatprep.subr.bf16.mxu0 %v437_v28 }
  0x54   :  { %265 = vmatpush1.bf16.msra.mxu1 %v439_v29  ;;  %306 = vmatpush1.bf16.msra.mxu0 %v439_v29 }
  0x55   :  { %266 = vmatprep.subr.bf16.mxu1 %v440_v31  ;;  %307 = vmatprep.subr.bf16.mxu0 %v440_v31 }
  0x58   :  { %267 = vmatpush1.bf16.msra.mxu1 %v442_v33  ;;  %308 = vmatpush1.bf16.msra.mxu0 %v442_v33 }
  0x59   :  { %268 = vmatprep.subr.bf16.mxu1 %v443_v34  ;;  %309 = vmatprep.subr.bf16.mxu0 %v443_v34 }
  0x5c   :  { %269 = vmatpush1.bf16.msra.mxu1 %v445_v36  ;;  %310 = vmatpush1.bf16.msra.mxu0 %v445_v36 }
  0x5d   :  { %270 = vmatprep.subr.bf16.mxu1 %v446_v37  ;;  %311 = vmatprep.subr.bf16.mxu0 %v446_v37 }
  0x60   :  { %271 = vmatpush1.bf16.msra.mxu1 %v448_v39  ;;  %312 = vmatpush1.bf16.msra.mxu0 %v448_v39 }
  0x61   :  { %272 = vmatprep.subr.bf16.mxu1 %v449_v40  ;;  %313 = vmatprep.subr.bf16.mxu0 %v449_v40 }
  0x64   :  { %273 = vmatpush1.bf16.msra.mxu1 %v451_v42  ;;  %314 = vmatpush1.bf16.msra.mxu0 %v451_v42 }
  0x67   :  { %275 = vmatmul.mubr.bf16.vlgmr.msra.gmra.mrb[0].mxu1 %v48_v43  ;;  %316 = vmatmul.mubr.bf16.vlgmr.msra.gmra.mrb[0].mxu0 %v42_v35 }
 0x13a   :  { %v276_v44 = vpop.f32.mrb[0].mxu1  ;;  %v317_v45 = vpop.f32.mrb[0].mxu0 }
 0x13b   :  { %v318_v46 = vadd.f32 %v317_v45, %v276_v44  ;;  %v278_v47 = vpop.f32.mrb[1].mxu1  ;;  %v319_v48 = vpop.f32.mrb[1].mxu0 }
 0x13c   :  { %v320_v49 = vadd.f32 %v319_v48, %v278_v47  ;;  %v280_v50 = vpop.f32.mrb[2].mxu1  ;;  %v321_v51 = vpop.f32.mrb[2].mxu0 }
 0x13d   :  { %v281_v52 = vpop.f32.mrb[3].mxu1  ;;  %v322_v53 = vpop.f32.mrb[3].mxu0  ;;  %v345_v54 = vmul.f32 0.0625, %v318_v46 }
 0x13e   :  { %v346_v55 = vmul.f32 0.0625, %v320_v49 }
 0x13f   :  { %347 = vst [vmem:[#allocation7] sm:$0xff] %v345_v54 }
 0x140   :  { %348 = vst [vmem:[#allocation7 + $0x8] sm:$0xff] %v346_v55 }
 0x141   :  { %507 = shalt.err (!%p504_p6)
}
 0x142   :  { %s508_s10 = scalar_lea.hbm %s589_s2, 256 }
 0x143   :  { %p509_p7 = scmp.ne.s32.totalorder %s589_s2, %s508_s10  ;;  %p512_p8 = scmp.lt.u32.totalorder %s508_s10, %s589_s2 }
 0x145   :  { %p514_p9 = pnand %p512_p8, %p509_p7 }
 0x147   :  { %517 = shalt.err (!%p514_p9)
}
 0x148   :  { %358 = dma.vmem_to_hbm [thread:$0]  %s356_s6, 256, %s589_s2, [#allocation4]  }
 0x149   :  { %522 = dma.done.wait [#allocation4], 256  }
 0x14a   :  { %523 = vsyncadd [#allocation4], 4294967040 }
 0x14b   :  { %362 = vsyncpa [#allocation3], 1 }
 0x14c   :  { %363 = vsyncpa [#allocation6], 1 }
 0x14d   :  { %364 = vsyncpa [#allocation4], 1 }

</bundles_post_ra>
